<compile_context>
chip_gen: v6e
topology: v6e:2x2x1
jax: 0.10.0
libtpu: 0.0.40
codegen_flags: <defaults>
</compile_context>

<pallas_src>
import numpy as np
import jax
import jax.numpy as jnp
from jax.experimental import pallas as pl
from jax.experimental.pallas import tpu as pltpu


# ----------------------------------------------------------------------------
# Pallas kernel: 2-layer MLP actor  (Linear -> ReLU -> Linear -> Tanh -> scale)
# bf16 matmul inputs, f32 accumulation, f32 elementwise (v5e has no bf16 VPU/EUP).
# ----------------------------------------------------------------------------
def _mlp_actor_kernel(ma_ref, x_ref, w1_ref, b1_ref, w2_ref, b2_ref, o_ref):
    x = x_ref[...].astype(jnp.bfloat16)                               # (TB, Din) bf16
    h = jnp.dot(x, w1_ref[...], preferred_element_type=jnp.float32)   # MXU, f32 acc
    h = jnp.maximum(h + b1_ref[...], 0.0)                             # bias + ReLU (VPU, f32)
    y = jnp.dot(h.astype(jnp.bfloat16), w2_ref[...],
                preferred_element_type=jnp.float32)                   # MXU, f32 acc
    y = y + b2_ref[...]
    ma = ma_ref[0, 0]                                                 # SMEM scalar
    o_ref[...] = (ma * jnp.tanh(y)).astype(o_ref.dtype)               # Tanh (EUP) + scale


def _single_block_cap():
    """Largest batch handled in one no-grid invocation, by TPU generation.

    The hidden activation costs ~8 KB/row of VMEM ((TB,1024) f32 + bf16 recast
    + lane-padded x/y/out); weights are only ~0.36 MB.  Caps stay well inside
    the default scoped-VMEM limit per generation (v5e 16 MiB, v6e/v7x 32 MiB),
    so no vmem_limit_bytes override is needed.
    """
    try:
        kind = jax.devices()[0].device_kind.lower()
    except Exception:
        kind = ""
    if "v5" in kind:
        return 1024
    return 2048


def mlp_actor(x, w1, b1, w2, b2, *, max_action, block_b=None):
    """x: (B, Din) f32 or bf16, w1/w2: bf16, b1/b2: f32  ->  (B, Dout_padded) f32.

    B <= tile : single invocation, whole problem resident in VMEM (no grid,
                no software-pipeline machinery).
    B >  tile : batch-tiled grid; weights stay resident (constant index_map).
    """
    B, Din = x.shape
    H = w1.shape[1]
    Dout = w2.shape[1]  # lane-padded (multiple of 128)

    tile = int(block_b) if block_b is not None else _single_block_cap()
    ma = jnp.full((1, 1), max_action, jnp.float32)

    bytes_accessed = (
        x.size * x.dtype.itemsize
        + w1.size * w1.dtype.itemsize + b1.size * b1.dtype.itemsize
        + w2.size * w2.dtype.itemsize + b2.size * b2.dtype.itemsize
        + B * Dout * 4
    )
    cost = pl.CostEstimate(
        flops=2 * B * (Din * H + H * Dout),
        transcendentals=B * Dout,
        bytes_accessed=bytes_accessed,
    )
    out_shape = jax.ShapeDtypeStruct((B, Dout), jnp.float32)
    smem = pl.BlockSpec(memory_space=pltpu.MemorySpace.SMEM)
    vmem = pl.BlockSpec(memory_space=pltpu.MemorySpace.VMEM)

    if B <= tile:
        # Single-block path: plain VMEM operands, no grid / software pipeline.
        return pl.pallas_call(
            _mlp_actor_kernel,
            out_shape=out_shape,
            in_specs=[smem, vmem, vmem, vmem, vmem, vmem],
            out_specs=vmem,
            cost_estimate=cost,
        )(ma, x, w1, b1, w2, b2)

    # Batch-tiled path (very large B): x/out blocked on rows, weights resident.
    assert tile % 8 == 0, "batch tile must satisfy the sublane constraint"
    grid = (pl.cdiv(B, tile),)
    return pl.pallas_call(
        _mlp_actor_kernel,
        out_shape=out_shape,
        grid=grid,
        in_specs=[
            smem,                                             # max_action scalar
            pl.BlockSpec((tile, Din), lambda i: (i, 0)),      # x rows
            pl.BlockSpec((Din, H), lambda i: (0, 0)),         # w1 resident
            pl.BlockSpec((1, H), lambda i: (0, 0)),           # b1 resident
            pl.BlockSpec((H, Dout), lambda i: (0, 0)),        # w2 resident
            pl.BlockSpec((1, Dout), lambda i: (0, 0)),        # b2 resident
        ],
        out_specs=pl.BlockSpec((tile, Dout), lambda i: (i, 0)),
        compiler_params=pltpu.CompilerParams(dimension_semantics=("parallel",)),
        cost_estimate=cost,
    )(ma, x, w1, b1, w2, b2)


# ----------------------------------------------------------------------------
# One-time parameter preparation:
#  * fold the limb_idx scatter/gather into static weight slicing (exact),
#  * zero-pad the output dimension to a multiple of 128 lanes (lane-dense
#    stores in the kernel; padded columns produce tanh(0)=0 and are sliced off),
#  * cast matmul weights to bf16 (biases stay f32).
# ----------------------------------------------------------------------------
def prepare_actor_params(w1, b1, w2, b2, *, limb_idx, state_dim, action_dim):
    limb_idx = np.asarray(limb_idx, dtype=np.int64)
    in_rows = (limb_idx[:, None] * state_dim + np.arange(state_dim)[None, :]).reshape(-1)
    out_cols = (limb_idx[:, None] * action_dim + np.arange(action_dim)[None, :]).reshape(-1)

    w1_np = np.asarray(w1, np.float32)
    b1_np = np.asarray(b1, np.float32)
    w2_np = np.asarray(w2, np.float32)
    b2_np = np.asarray(b2, np.float32)

    H = w1_np.shape[1]
    dout = int(out_cols.shape[0])
    dout_pad = max(128, ((dout + 127) // 128) * 128)

    w2a = np.zeros((H, dout_pad), np.float32)
    w2a[:, :dout] = w2_np[:, out_cols]
    b2a = np.zeros((1, dout_pad), np.float32)
    b2a[:, :dout] = b2_np[:, out_cols]

    return (
        jnp.asarray(w1_np[in_rows, :], jnp.bfloat16),   # (num_limbs*state_dim, H)
        jnp.asarray(b1_np, jnp.float32),                # (1, H)
        jnp.asarray(w2a, jnp.bfloat16),                 # (H, dout_pad)
        jnp.asarray(b2a, jnp.float32),                  # (1, dout_pad)
        dout,                                           # real gathered action width
    )


def consistent_mlp_policy_forward(state, active_params, *, max_action, block_b=None):
    """state: (B, num_limbs*state_dim) -> squeeze((B, num_limbs*action_dim))."""
    w1a, b1, w2a, b2a, dout = active_params
    action = mlp_actor(state, w1a, b1, w2a, b2a, max_action=max_action, block_b=block_b)
    return jnp.squeeze(action[:, :dout])


# ----------------------------------------------------------------------------
# Deterministic parameter init (shapes from the module's __init__):
#   nn.Linear(state_dim*M, 1024), nn.Linear(1024, action_dim*M)
# Weights stored transposed as (fan_in, fan_out) so y = x @ W + b.
# ----------------------------------------------------------------------------
def init_params(key, state_dim, action_dim, monolithic_max_agent, hidden=1024):
    Din = state_dim * monolithic_max_agent
    Dout = action_dim * monolithic_max_agent
    k1, k2, k3, k4 = jax.random.split(key, 4)
    bound1 = 1.0 / jnp.sqrt(Din)
    bound2 = 1.0 / jnp.sqrt(hidden)
    w1 = jax.random.uniform(k1, (Din, hidden), jnp.float32, -bound1, bound1)
    b1 = jax.random.uniform(k2, (1, hidden), jnp.float32, -bound1, bound1)
    w2 = jax.random.uniform(k3, (hidden, Dout), jnp.float32, -bound2, bound2)
    b2 = jax.random.uniform(k4, (1, Dout), jnp.float32, -bound2, bound2)
    return w1, b1, w2, b2


def _bf16_matched_reference(state, active_params, max_action):
    """Pure-JAX reference with the same bf16-in / f32-acc numerics as the kernel."""
    w1a, b1, w2a, b2a, dout = active_params
    h = jnp.dot(state.astype(jnp.bfloat16), w1a, preferred_element_type=jnp.float32)
    h = jnp.maximum(h + b1, 0.0)
    y = jnp.dot(h.astype(jnp.bfloat16), w2a, preferred_element_type=jnp.float32) + b2a
    return jnp.squeeze((max_action * jnp.tanh(y))[:, :dout])


def _fp32_module_reference(state, params, *, limb_idx, M, state_dim, action_dim, max_action):
    """Pure-JAX fp32 reference replicating the original PyTorch module exactly."""
    w1, b1, w2, b2 = params
    B = state.shape[0]
    inpt = jnp.zeros((B, M, state_dim), jnp.float32)
    inpt = inpt.at[:, limb_idx, :].set(state.reshape(B, -1, state_dim))
    x = inpt.reshape(B, -1)
    a = jnp.tanh(jnp.maximum(x @ w1 + b1, 0.0) @ w2 + b2)
    a = a.reshape(B, M, action_dim)[:, limb_idx, :].reshape(B, -1)
    return jnp.squeeze(max_action * a)


if __name__ == "__main__":
    # Small, module-consistent configuration (humanoid_2d family):
    # full morphology has 9 limbs; this env uses 7 of them.
    batch = 2
    state_dim = 12
    action_dim = 1
    monolithic_max_agent = 9
    max_action = 0.99
    limb_idx = np.array([0, 1, 2, 4, 5, 7, 8], dtype=np.int32)   # 7 active limbs
    num_limbs = int(limb_idx.shape[0])

    key = jax.random.PRNGKey(0)
    k_state, k_params, k_mid, k_big = jax.random.split(key, 4)
    state = jax.random.normal(k_state, (batch, num_limbs * state_dim), jnp.float32)
    params = init_params(k_params, state_dim, action_dim, monolithic_max_agent)
    active_params = prepare_actor_params(
        *params, limb_idx=limb_idx, state_dim=state_dim, action_dim=action_dim)

    # --- tiny batch (single-block, no-grid) path ---------------------------------
    out = consistent_mlp_policy_forward(state, active_params, max_action=max_action)
    out = jax.block_until_ready(out)
    assert out.shape == (batch, num_limbs * action_dim), out.shape

    ref_bf16 = _bf16_matched_reference(state, active_params, max_action)
    ref_fp32 = _fp32_module_reference(
        state, params, limb_idx=jnp.asarray(limb_idx), M=monolithic_max_agent,
        state_dim=state_dim, action_dim=action_dim, max_action=max_action)
    assert jnp.allclose(out, ref_bf16, atol=1e-3, rtol=1e-3), "mismatch vs bf16 reference"
    assert jnp.allclose(out, ref_fp32, atol=3e-2, rtol=3e-2), "mismatch vs fp32 module reference"

    # --- moderate batch: now takes the single-block path by default --------------
    mid_batch = 512
    mid_state = jax.random.normal(k_mid, (mid_batch, num_limbs * state_dim), jnp.float32)
    mid_out = consistent_mlp_policy_forward(mid_state, active_params, max_action=max_action)
    mid_out = jax.block_until_ready(mid_out)
    mid_ref = _bf16_matched_reference(mid_state, active_params, max_action)
    assert mid_out.shape == (mid_batch, num_limbs * action_dim), mid_out.shape
    assert jnp.allclose(mid_out, mid_ref, atol=1e-3, rtol=1e-3), "single-block B=512 mismatch"

    # --- grid path, forced small tile, ragged last tile (B not multiple of tile) --
    big_batch = 300
    big_state = jax.random.normal(k_big, (big_batch, num_limbs * state_dim), jnp.float32)
    big_out = consistent_mlp_policy_forward(
        big_state, active_params, max_action=max_action, block_b=128)
    big_out = jax.block_until_ready(big_out)
    big_ref = _bf16_matched_reference(big_state, active_params, max_action)
    assert big_out.shape == (big_batch, num_limbs * action_dim), big_out.shape
    assert jnp.allclose(big_out, big_ref, atol=1e-3, rtol=1e-3), "ragged tiled path mismatch"

    print("KERNEL_OK")
</pallas_src>

<mosaic_0001>
module attributes {stable_mosaic.version = 11 : i64} {
  func.func @_mlp_actor_kernel(%arg0: memref<1x1xf32, #tpu.memory_space<smem>>, %arg1: memref<2x84xf32, #tpu.memory_space<vmem>>, %arg2: memref<84x1024xbf16, #tpu.memory_space<vmem>>, %arg3: memref<1x1024xf32, #tpu.memory_space<vmem>>, %arg4: memref<1024x128xbf16, #tpu.memory_space<vmem>>, %arg5: memref<1x128xf32, #tpu.memory_space<vmem>>, %arg6: memref<2x128xf32, #tpu.memory_space<vmem>>) attributes {dimension_semantics = [], scalar_prefetch = 0 : i64, scratch_operands = 0 : i64, tpu.core_type = #tpu.core_type<tc>} {
    %c0 = arith.constant 0 : index
    %c0_0 = arith.constant 0 : index
    %0 = vector.load %arg1[%c0, %c0_0] : memref<2x84xf32, #tpu.memory_space<vmem>>, vector<2x84xf32>
    %1 = arith.truncf %0 : vector<2x84xf32> to vector<2x84xbf16>
    %c0_1 = arith.constant 0 : index
    %c0_2 = arith.constant 0 : index
    %2 = vector.load %arg2[%c0_1, %c0_2] : memref<84x1024xbf16, #tpu.memory_space<vmem>>, vector<84x1024xbf16>
    %cst = arith.constant dense<0.000000e+00> : vector<2x1024xf32>
    %3 = tpu.matmul %1, %2, %cst {dimension_numbers = #tpu.dot_dimension_numbers<[1], [0], [0], [1], [0, 0, 1, 1], [], []>} : vector<2x84xbf16>, vector<84x1024xbf16>, vector<2x1024xf32> -> vector<2x1024xf32>
    %c0_3 = arith.constant 0 : index
    %c0_4 = arith.constant 0 : index
    %4 = vector.load %arg3[%c0_3, %c0_4] : memref<1x1024xf32, #tpu.memory_space<vmem>>, vector<1x1024xf32>
    %5 = vector.broadcast %4 : vector<1x1024xf32> to vector<2x1024xf32>
    %6 = arith.addf %3, %5 : vector<2x1024xf32>
    %cst_5 = arith.constant 0.000000e+00 : f32
    %7 = vector.broadcast %cst_5 : f32 to vector<2x1024xf32>
    %8 = arith.maximumf %6, %7 : vector<2x1024xf32>
    %9 = arith.truncf %8 : vector<2x1024xf32> to vector<2x1024xbf16>
    %c0_6 = arith.constant 0 : index
    %c0_7 = arith.constant 0 : index
    %10 = vector.load %arg4[%c0_6, %c0_7] : memref<1024x128xbf16, #tpu.memory_space<vmem>>, vector<1024x128xbf16>
    %cst_8 = arith.constant dense<0.000000e+00> : vector<2x128xf32>
    %11 = tpu.matmul %9, %10, %cst_8 {dimension_numbers = #tpu.dot_dimension_numbers<[1], [0], [0], [1], [0, 0, 1, 1], [], []>} : vector<2x1024xbf16>, vector<1024x128xbf16>, vector<2x128xf32> -> vector<2x128xf32>
    %c0_9 = arith.constant 0 : index
    %c0_10 = arith.constant 0 : index
    %12 = vector.load %arg5[%c0_9, %c0_10] : memref<1x128xf32, #tpu.memory_space<vmem>>, vector<1x128xf32>
    %13 = vector.broadcast %12 : vector<1x128xf32> to vector<2x128xf32>
    %14 = arith.addf %11, %13 : vector<2x128xf32>
    %c0_11 = arith.constant 0 : index
    %c0_12 = arith.constant 0 : index
    %15 = memref.load %arg0[%c0_11, %c0_12] : memref<1x1xf32, #tpu.memory_space<smem>>
    %16 = math.tanh %14 : vector<2x128xf32>
    %17 = vector.broadcast %15 : f32 to vector<2x128xf32>
    %18 = arith.mulf %17, %16 : vector<2x128xf32>
    %c0_13 = arith.constant 0 : index
    %c0_14 = arith.constant 0 : index
    %19 = vector.load %arg6[%c0_13, %c0_14] : memref<2x128xf32, #tpu.memory_space<vmem>>, vector<2x128xf32>
    tpu.vector_store %arg6[%c0_13, %c0_14], %18 {strides = array<i32>} : memref<2x128xf32, #tpu.memory_space<vmem>>, vector<2x128xf32>,
    return
  }
}

</mosaic_0001>

<bundles_post_ra>
// kernel: tpu_custom_call.1
= control target key start
LH: loop header
LB: loop body
LE: loop exit
PB: predicated region body
PF: predicated region fallthrough
CT: control target
= control target key end

     0   :  { %12 = vsyncpa [#allocation4], 0  ;;  %s1767_s0 = inlined_call_operand.<no memory space> [shape: f32[1,1], index: 0, kind: input, shape index: {}]   ;;  %s1768_s1 = inlined_call_operand.vmem [shape: f32[2,84], index: 1, kind: input, shape index: {}]   ;;  %s1769_s2 = inlined_call_operand.hbm [shape: bf16[84,1024], index: 2, kind: input, shape index: {}]   ;;  %s1770_s3 = inlined_call_operand.hbm [shape: f32[1,1024], index: 3, kind: input, shape index: {}]   ;;  %s1771_s4 = inlined_call_operand.hbm [shape: bf16[1024,128], index: 4, kind: input, shape index: {}]   ;;  %s1772_s5 = inlined_call_operand.vmem [shape: f32[1,128], index: 5, kind: input, shape index: {}]   ;;  %s1773_s6 = inlined_call_operand.hbm [shape: f32[2,128], index: 6, kind: output, shape index: {}]  }
   0x1   :  { %13 = vsyncpa [#allocation7], 0 }
   0x2   :  { %14 = vsyncpa [#allocation5], 0  ;;  %s1660_s21 = smov [#allocation6]   ;;  %s1661_s23 = smov [#allocation3]  }
   0x3   :  { %s37_s22 = sshll.u32 %s1660_s21, 4  ;;  %s24_s24 = sshll.u32 %s1661_s23, 4  ;;  %s38_s22 = int_to_ptr.vmem [resolvable:$true] %s37_s22  ;;  %s25_s24 = int_to_ptr.vmem [resolvable:$true] %s24_s24 }
   0x4   :  { %s1582_s25 = scalar_lea.vmem %s38_s22, 128  ;;  %p1587_p1 = scmp.lt.s32.totalorder %s38_s22, %s38_s22 }
   0x5   :  { %p1583_p0 = scmp.ne.s32.totalorder %s38_s22, %s1582_s25  ;;  %p1588_p2 = scmp.lt.s32.totalorder %s1582_s25, %s1582_s25 }
   0x7   :  { %p1589_p3 = por %p1588_p2, %p1587_p1 }
   0x9   :  { %p1590_p4 = pnand %p1589_p3, %p1583_p0 }
   0xb   :  { %1593 = shalt.err (!%p1590_p4)
}
   0xc   :  { %40 = dma.hbm_to_vmem [thread:$0]  %s1770_s3, 128, %s38_s22, [#allocation7]  }
   0xd   :  { %s1602_s28 = scalar_lea.vmem %s25_s24, 5632  ;;  %p1607_p6 = scmp.lt.s32.totalorder %s25_s24, %s25_s24 }
   0xe   :  { %p1603_p5 = scmp.ne.s32.totalorder %s25_s24, %s1602_s28  ;;  %p1608_p7 = scmp.lt.s32.totalorder %s1602_s28, %s1602_s28 }
  0x10   :  { %p1609_p8 = por %p1608_p7, %p1607_p6 }
  0x12   :  { %p1610_p9 = pnand %p1609_p8, %p1603_p5 }
  0x14   :  { %1613 = shalt.err (!%p1610_p9)
}
  0x15   :  { %s1662_s29 = smov 512   ;;  %s1663_s30 = smov 32  }
  0x16   :  { %30 = dma.hbm_to_vmem [thread:$0]  %s1769_s2, 5632, %s25_s24, [#allocation4], %s1662_s29, %s1662_s29, %s1663_s30  }
  0x17   :  { %s1664_s9 = smov [#allocation8]  }
  0x18   :  { %s46_s10 = sshll.u32 %s1664_s9, 4  ;;  %s47_s10 = int_to_ptr.vmem [resolvable:$true] %s46_s10 }
  0x19   :  { %s1622_s11 = scalar_lea.vmem %s47_s10, 8192  ;;  %p1627_p11 = scmp.lt.s32.totalorder %s47_s10, %s47_s10 }
  0x1a   :  { %p1623_p10 = scmp.ne.s32.totalorder %s47_s10, %s1622_s11  ;;  %p1628_p12 = scmp.lt.s32.totalorder %s1622_s11, %s1622_s11 }
  0x1c   :  { %p1629_p13 = por %p1628_p12, %p1627_p11 }
  0x1e   :  { %p1630_p0 = pnand %p1629_p13, %p1623_p10 }
  0x20   :  { %1633 = shalt.err (!%p1630_p0)
}
  0x21   :  { %s1665_s3 = smov 64   ;;  %s1666_s12 = smov 4  }
  0x22   :  { %52 = dma.hbm_to_vmem [thread:$0]  %s1771_s4, 8192, %s47_s10, [#allocation7], %s1665_s3, %s1665_s3, %s1666_s12  }
  0x23   :  { %1654 = dma.done.wait [#allocation4], 5632  }
  0x24   :  { %1655 = vsyncadd [#allocation4], 4294961664 }
  0x25   :  { %1656 = dma.done.wait [#allocation7], 8320  }
  0x26   :  { %1657 = vsyncadd [#allocation7], 4294958976  ;;  %v1667_v0 = vmov 0   ;;  %v107_v1 = vld [vmem:[#allocation3 + $0x140] sm:$0x33]  ;;  %vm377_vm0 = vcmask 1041408  }
  0x27   :  { %434 = vmatprep.mubr.bf16.mxu0 %v1667_v0  ;;  %475 = vmatprep.mubr.bf16.mxu1 %v1667_v0  ;;  %v108_v2 = vld [vmem:[#allocation3 + $0x148] sm:$0x33]  ;;  %v99_v3 = vld [vmem:[#allocation3 + $0x100] sm:$0xff]  ;;  %v1323_v4 = vcombine.high %v107_v1, %v107_v1  ;;  %v1322_v6 = vcombine.low %v107_v1, %v107_v1  ;;  %v109_v47 = vld [vmem:[#allocation3 + $0x150] sm:$0x33]  ;;  %vm373_vm1 = vcmask 687104  }
  0x28   :  { %v1325_v5 = vcombine.high %v108_v2, %v108_v2  ;;  %v1324_v7 = vcombine.low %v108_v2, %v108_v2  ;;  %v103_v8 = vld [vmem:[#allocation3 + $0x120] sm:$0xff]  ;;  %v100_v9 = vld [vmem:[#allocation3 + $0x108] sm:$0xff]  ;;  %v110_v48 = vld [vmem:[#allocation3 + $0x158] sm:$0x33]  ;;  %v1327_v52 = vcombine.high %v109_v47, %v109_v47  ;;  %v1326_v55 = vcombine.low %v109_v47, %v109_v47 }
  0x29   :  { %v104_v10 = vld [vmem:[#allocation3 + $0x128] sm:$0xff]  ;;  %v1315_v11 = vcombine.high %v99_v3, %v103_v8  ;;  %v91_v13 = vld [vmem:[#allocation3 + $0xc0] sm:$0xff]  ;;  %1330 = vmatprep.subr.msk.bf16.mxu0 %vm377_vm0, %v1323_v4  ;;  %v379_v16 = vsel %vm377_vm0, %v1322_v6, 0  ;;  %v1314_v19 = vcombine.low %v99_v3, %v103_v8  ;;  %v101_v53 = vld [vmem:[#allocation3 + $0x110] sm:$0xff]  ;;  %v1329_v56 = vcombine.high %v110_v48, %v110_v48 }
  0x2a   :  { %v1317_v12 = vcombine.high %v100_v9, %v104_v10  ;;  %v95_v14 = vld [vmem:[#allocation3 + $0xe0] sm:$0xff]  ;;  %v92_v15 = vld [vmem:[#allocation3 + $0xc8] sm:$0xff]  ;;  %1332 = vmatprep.subr.msk.bf16.mxu1 %vm377_vm0, %v1325_v5  ;;  %v385_v17 = vsel %vm377_vm0, %v1324_v7, 0  ;;  %407 = vmatpush1.bf16.msra.mxu0 %v379_v16  ;;  %v1316_v20 = vcombine.low %v100_v9, %v104_v10  ;;  %v105_v54 = vld [vmem:[#allocation3 + $0x130] sm:$0xff]  ;;  %v1328_v57 = vcombine.low %v110_v48, %v110_v48 }
  0x2b   :  { %v96_v18 = vld [vmem:[#allocation3 + $0xe8] sm:$0xff]  ;;  %448 = vmatpush1.bf16.msra.mxu1 %v385_v17  ;;  %408 = vmatprep.subr.bf16.mxu0 %v1315_v11  ;;  %v1307_v21 = vcombine.high %v91_v13, %v95_v14  ;;  %v83_v23 = vld [vmem:[#allocation3 + $0x80] sm:$0xff]  ;;  %v1306_v27 = vcombine.low %v91_v13, %v95_v14  ;;  %v102_v58 = vld [vmem:[#allocation3 + $0x118] sm:$0xff]  ;;  %v391_v1 = vsel %vm377_vm0, %v1326_v55, 0  ;;  %v1319_v3 = vcombine.high %v101_v53, %v105_v54 }
  0x2c   :  { %449 = vmatprep.subr.bf16.mxu1 %v1317_v12  ;;  %v1309_v22 = vcombine.high %v92_v15, %v96_v18  ;;  %v87_v24 = vld [vmem:[#allocation3 + $0xa0] sm:$0xff]  ;;  %v84_v25 = vld [vmem:[#allocation3 + $0x88] sm:$0xff]  ;;  %v1308_v28 = vcombine.low %v92_v15, %v96_v18  ;;  %v106_v59 = vld [vmem:[#allocation3 + $0x138] sm:$0xff]  ;;  %v397_v2 = vsel %vm377_vm0, %v1328_v57, 0  ;;  %v1318_v6 = vcombine.low %v101_v53, %v105_v54 }
  0x2d   :  { %v88_v26 = vld [vmem:[#allocation3 + $0xa8] sm:$0xff]  ;;  %v1299_v29 = vcombine.high %v83_v23, %v87_v24  ;;  %v75_v31 = vld [vmem:[#allocation3 + $0x40] sm:$0xff]  ;;  %v1298_v35 = vcombine.low %v83_v23, %v87_v24  ;;  %v93_v61 = vld [vmem:[#allocation3 + $0xd0] sm:$0xff]  ;;  %v1321_v4 = vcombine.high %v102_v58, %v106_v59  ;;  %v1320_v7 = vcombine.low %v102_v58, %v106_v59 }
  0x2e   :  { %409 = vmatpush1.bf16.msra.mxu0 %v1314_v19  ;;  %v1301_v30 = vcombine.high %v84_v25, %v88_v26  ;;  %v79_v32 = vld [vmem:[#allocation3 + $0x60] sm:$0xff]  ;;  %v76_v33 = vld [vmem:[#allocation3 + $0x48] sm:$0xff]  ;;  %v1300_v36 = vcombine.low %v84_v25, %v88_v26  ;;  %v97_v62 = vld [vmem:[#allocation3 + $0xf0] sm:$0xff] }
  0x2f   :  { %450 = vmatpush1.bf16.msra.mxu1 %v1316_v20  ;;  %410 = vmatprep.subr.bf16.mxu0 %v1307_v21  ;;  %v80_v34 = vld [vmem:[#allocation3 + $0x68] sm:$0xff]  ;;  %v1291_v37 = vcombine.high %v75_v31, %v79_v32  ;;  %v67_v39 = vld [vmem:[#allocation3] sm:$0xff]  ;;  %v1290_v43 = vcombine.low %v75_v31, %v79_v32  ;;  %v94_v63 = vld [vmem:[#allocation3 + $0xd8] sm:$0xff]  ;;  %v1311_v10 = vcombine.high %v93_v61, %v97_v62 }
  0x30   :  { %451 = vmatprep.subr.bf16.mxu1 %v1309_v22  ;;  %v1293_v38 = vcombine.high %v76_v33, %v80_v34  ;;  %v71_v40 = vld [vmem:[#allocation3 + $0x20] sm:$0xff]  ;;  %v68_v41 = vld [vmem:[#allocation3 + $0x8] sm:$0xff]  ;;  %v1292_v44 = vcombine.low %v76_v33, %v80_v34  ;;  %v98_v5 = vld [vmem:[#allocation3 + $0xf8] sm:$0xff]  ;;  %v1310_v14 = vcombine.low %v93_v61, %v97_v62 }
  0x31   :  { %v72_v42 = vld [vmem:[#allocation3 + $0x28] sm:$0xff]  ;;  %v1283_v45 = vcombine.high %v67_v39, %v71_v40  ;;  %v65_v49 = vld [vmem:[%s1768_s1] sm:$0x3]  ;;  %v1282_v50 = vcombine.low %v67_v39, %v71_v40  ;;  %v85_v8 = vld [vmem:[#allocation3 + $0x90] sm:$0xff]  ;;  %v1313_v11 = vcombine.high %v94_v63, %v98_v5  ;;  %v1312_v15 = vcombine.low %v94_v63, %v98_v5 }
  0x32   :  { %411 = vmatpush1.bf16.msra.mxu0 %v1306_v27  ;;  %v1285_v46 = vcombine.high %v68_v41, %v72_v42  ;;  %v1284_v51 = vcombine.low %v68_v41, %v72_v42  ;;  %v1722_v60 = vpack.c.bf16 %v65_v49, %v65_v49  ;;  %v89_v9 = vld [vmem:[#allocation3 + $0xb0] sm:$0xff]  ;;  %v86_v12 = vld [vmem:[#allocation3 + $0x98] sm:$0xff]  ;;  %v1508_v33 = vld [vmem:[#allocation8 + $0x78] sm:$0xff]  }
  0x33   :  { %452 = vmatpush1.bf16.msra.mxu1 %v1308_v28  ;;  %412 = vmatprep.subr.bf16.mxu0 %v1299_v29  ;;  %v90_v13 = vld [vmem:[#allocation3 + $0xb8] sm:$0xff]  ;;  %v77_v16 = vld [vmem:[#allocation3 + $0x50] sm:$0xff]  ;;  %v1303_v18 = vcombine.high %v85_v8, %v89_v9  ;;  %v1302_v22 = vcombine.low %v85_v8, %v89_v9  ;;  %v1509_v34 = vld [vmem:[#allocation8 + $0xf8] sm:$0xff]  }
  0x34   :  { %453 = vmatprep.subr.bf16.mxu1 %v1301_v30  ;;  %v81_v17 = vld [vmem:[#allocation3 + $0x70] sm:$0xff]  ;;  %v1305_v19 = vcombine.high %v86_v12, %v90_v13  ;;  %v78_v20 = vld [vmem:[#allocation3 + $0x58] sm:$0xff]  ;;  %v1304_v23 = vcombine.low %v86_v12, %v90_v13  ;;  %v1520_v47 = vld [vmem:[#allocation8 + $0x60] sm:$0xff]  }
  0x35   :  { %v82_v21 = vld [vmem:[#allocation3 + $0x78] sm:$0xff]  ;;  %v69_v24 = vld [vmem:[#allocation3 + $0x10] sm:$0xff]  ;;  %v1294_v29 = vcombine.low %v77_v16, %v81_v17  ;;  %v1521_v48 = vld [vmem:[#allocation8 + $0xe0] sm:$0xff]  }
  0x36   :  { %413 = vmatpush1.bf16.msra.mxu0 %v1298_v35  ;;  %v73_v25 = vld [vmem:[#allocation3 + $0x30] sm:$0xff]  ;;  %v1297_v26 = vcombine.high %v78_v20, %v82_v21  ;;  %v70_v27 = vld [vmem:[#allocation3 + $0x18] sm:$0xff]  ;;  %v1296_v30 = vcombine.low %v78_v20, %v82_v21  ;;  %v1522_v49 = vld [vmem:[#allocation8 + $0x20] sm:$0xff]  }
  0x37   :  { %454 = vmatpush1.bf16.msra.mxu1 %v1300_v36  ;;  %414 = vmatprep.subr.bf16.mxu0 %v1291_v37  ;;  %v74_v28 = vld [vmem:[#allocation3 + $0x38] sm:$0xff]  ;;  %v1287_v31 = vcombine.high %v69_v24, %v73_v25  ;;  %v1286_v35 = vcombine.low %v69_v24, %v73_v25  ;;  %v1510_v37 = vld [vmem:[#allocation8 + $0x38] sm:$0xff]   ;;  %v1532_v59 = vld [vmem:[#allocation8 + $0x48] sm:$0xff]  }
  0x38   :  { %455 = vmatprep.subr.bf16.mxu1 %v1293_v38  ;;  %v1289_v32 = vcombine.high %v70_v27, %v74_v28  ;;  %v1288_v36 = vcombine.low %v70_v27, %v74_v28  ;;  %v1511_v38 = vld [vmem:[#allocation8 + $0xb8] sm:$0xff]   ;;  %v1512_v39 = vld [vmem:[#allocation8 + $0x70] sm:$0xff]   ;;  %v1534_v61 = vld [vmem:[#allocation8 + $0x8] sm:$0xff]  }
  0x39   :  { %v1513_v40 = vld [vmem:[#allocation8 + $0xf0] sm:$0xff]   ;;  %v1526_v53 = vld [vmem:[#allocation8 + $0x18] sm:$0xff]   ;;  %v1535_v62 = vld [vmem:[#allocation8 + $0x88] sm:$0xff]  }
  0x3a   :  { %415 = vmatpush1.bf16.msra.mxu0 %v1290_v43  ;;  %v1514_v41 = vld [vmem:[#allocation8 + $0x30] sm:$0xff]   ;;  %v1516_v43 = vld [vmem:[#allocation8 + $0x68] sm:$0xff]   ;;  %v1527_v54 = vld [vmem:[#allocation8 + $0x98] sm:$0xff]  }
  0x3b   :  { %456 = vmatpush1.bf16.msra.mxu1 %v1292_v44  ;;  %416 = vmatprep.subr.bf16.mxu0 %v1283_v45  ;;  %v1515_v42 = vld [vmem:[#allocation8 + $0xb0] sm:$0xff]   ;;  %v1517_v44 = vld [vmem:[#allocation8 + $0xe8] sm:$0xff]   ;;  %v1536_v63 = vld [vmem:[#allocation8 + $0x40] sm:$0xff]  }
  0x3c   :  { %457 = vmatprep.subr.bf16.mxu1 %v1285_v46  ;;  %v1518_v45 = vld [vmem:[#allocation8 + $0x28] sm:$0xff]   ;;  %v1528_v55 = vld [vmem:[#allocation8 + $0x50] sm:$0xff]   ;;  %v1541_v5 = vld [vmem:[#allocation8 + $0x1f8] sm:$0xff]  }
  0x3d   :  { %v1519_v46 = vld [vmem:[#allocation8 + $0xa8] sm:$0xff]   ;;  %v1530_v57 = vld [vmem:[#allocation8 + $0x10] sm:$0xff]  }
  0x3e   :  { %417 = vmatpush1.bf16.msra.mxu0 %v1282_v50  ;;  %v1523_v50 = vld [vmem:[#allocation8 + $0xa0] sm:$0xff]   ;;  %v1531_v58 = vld [vmem:[#allocation8 + $0x90] sm:$0xff]  }
  0x3f   :  { %458 = vmatpush1.bf16.msra.mxu1 %v1284_v51  ;;  %1334 = vmatprep.subr.msk.bf16.mxu0 %vm377_vm0, %v1327_v52  ;;  %v1524_v51 = vld [vmem:[#allocation8 + $0x58] sm:$0xff]  }
  0x40   :  { %1336 = vmatprep.subr.msk.bf16.mxu1 %vm377_vm0, %v1329_v56  ;;  %v1525_v52 = vld [vmem:[#allocation8 + $0xd8] sm:$0xff]   ;;  %v1529_v56 = vld [vmem:[#allocation8 + $0xd0] sm:$0xff]  }
  0x41   :  { %1331 = vmatmul.mubr.msk.bf16.vlgmr.msra.gmra.mxu0 %vm373_vm1, %v1722_v60 }
  0x42   :  { %1333 = vmatmul.mubr.msk.bf16.vlgmr.msra.gmra.mxu1 %vm373_vm1, %v1722_v60  ;;  %489 = vmatpush1.bf16.msra.mxu0 %v391_v1  ;;  %v1537_v1 = vld [vmem:[#allocation8 + $0xc0] sm:$0xff]  }
  0x43   :  { %530 = vmatpush1.bf16.msra.mxu1 %v397_v2  ;;  %490 = vmatprep.subr.bf16.mxu0 %v1319_v3  ;;  %v1538_v2 = vld [vmem:[#allocation8] sm:$0xff]  }
  0x44   :  { %531 = vmatprep.subr.bf16.mxu1 %v1321_v4  ;;  %516 = vmatprep.mubr.bf16.mxu0 %v1667_v0  ;;  %v1539_v3 = vld [vmem:[#allocation8 + $0x80] sm:$0xff]   ;;  %v1540_v4 = vld [vmem:[#allocation8 + $0x178] sm:$0xff]  }
  0x45   :  { %557 = vmatprep.mubr.bf16.mxu1 %v1667_v0  ;;  %v1295_v0 = vcombine.high %v77_v16, %v81_v17 }
  0x46   :  { %491 = vmatpush1.bf16.msra.mxu0 %v1318_v6  ;;  %v113_v6 = vlaneseq }
  0x47   :  { %532 = vmatpush1.bf16.msra.mxu1 %v1320_v7  ;;  %492 = vmatprep.subr.bf16.mxu0 %v1311_v10  ;;  %v1742_v10 = vld [vmem:[#allocation6] sm:$0xff] }
  0x48   :  { %533 = vmatprep.subr.bf16.mxu1 %v1313_v11  ;;  %v1738_v7 = vshrl.u32 %v113_v6, 7  ;;  %v1562_v6 = vld [vmem:[#allocation8 + $0x110] sm:$0xff]  }
  0x4a   :  { %493 = vmatpush1.bf16.msra.mxu0 %v1310_v14  ;;  %v115_v8 = vsub.s32 0, %v1738_v7  ;;  %v123_v9 = vsub.s32 2, %v1738_v7  ;;  %v119_v11 = vsub.s32 1, %v1738_v7  ;;  %v127_v12 = vsub.s32 3, %v1738_v7 }
  0x4b   :  { %534 = vmatpush1.bf16.msra.mxu1 %v1312_v15  ;;  %494 = vmatprep.subr.bf16.mxu0 %v1303_v18 }
  0x4c   :  { %535 = vmatprep.subr.bf16.mxu1 %v1305_v19  ;;  %v116_v13 = vrot.slane %v1742_v10, %v115_v8  ;;  %v124_v14 = vrot.slane %v1742_v10, %v123_v9  ;;  %v120_v15 = vrot.slane %v1742_v10, %v119_v11  ;;  %v128_v16 = vrot.slane %v1742_v10, %v127_v12  ;;  %v1563_v8 = vld [vmem:[#allocation8 + $0x190] sm:$0xff]   ;;  %v1564_v12 = vld [vmem:[#allocation8 + $0x148] sm:$0xff]  }
  0x4e   :  { %495 = vmatpush1.bf16.msra.mxu0 %v1302_v22 }
  0x4f   :  { %536 = vmatpush1.bf16.msra.mxu1 %v1304_v23  ;;  %496 = vmatprep.subr.bf16.mxu0 %v1295_v0 }
  0x50   :  { %537 = vmatprep.subr.bf16.mxu1 %v1297_v26 }
  0x52   :  { %497 = vmatpush1.bf16.msra.mxu0 %v1294_v29 }
  0x53   :  { %538 = vmatpush1.bf16.msra.mxu1 %v1296_v30  ;;  %498 = vmatprep.subr.bf16.mxu0 %v1287_v31 }
  0x54   :  { %539 = vmatprep.subr.bf16.mxu1 %v1289_v32 }
  0x56   :  { %499 = vmatpush1.bf16.msra.mxu0 %v1286_v35  ;;  %v1542_v35 = vld [vmem:[#allocation8 + $0x138] sm:$0xff]  }
  0x57   :  { %540 = vmatpush1.bf16.msra.mxu1 %v1288_v36  ;;  %1403 = vmatprep.subr.bf16.mxu0 %v1508_v33  ;;  %v1543_v36 = vld [vmem:[#allocation8 + $0x1b8] sm:$0xff]  }
  0x58   :  { %1425 = vmatprep.subr.bf16.mxu1 %v1509_v34 }
  0x59   :  { %1335 = vmatmul.mubr.msk.bf16.vlgmr.msra.gmra.mxu0 %vm373_vm1, %v1722_v60 }
  0x5a   :  { %1337 = vmatmul.mubr.msk.bf16.vlgmr.msra.gmra.mxu1 %vm373_vm1, %v1722_v60  ;;  %1404 = vmatpush3.bf16.msra.mxu0 %v1510_v37  ;;  %v1533_v60 = vld [vmem:[#allocation8 + $0xc8] sm:$0xff]  }
  0x5b   :  { %1426 = vmatpush3.bf16.msra.mxu1 %v1511_v38  ;;  %1405 = vmatprep.subr.bf16.mxu0 %v1512_v39  ;;  %v1544_v38 = vld [vmem:[#allocation8 + $0x170] sm:$0xff]  }
  0x5c   :  { %1427 = vmatprep.subr.bf16.mxu1 %v1513_v40  ;;  %v1545_v39 = vld [vmem:[#allocation8 + $0x1f0] sm:$0xff]  }
  0x5d   :  { %v1546_v40 = vld [vmem:[#allocation8 + $0x130] sm:$0xff]  }
  0x5e   :  { %1406 = vmatpush3.bf16.msra.mxu0 %v1514_v41  ;;  %v1547_v41 = vld [vmem:[#allocation8 + $0x1b0] sm:$0xff]  }
  0x5f   :  { %1428 = vmatpush3.bf16.msra.mxu1 %v1515_v42  ;;  %1407 = vmatprep.subr.bf16.mxu0 %v1516_v43  ;;  %v1548_v42 = vld [vmem:[#allocation8 + $0x168] sm:$0xff]  }
  0x60   :  { %1429 = vmatprep.subr.bf16.mxu1 %v1517_v44  ;;  %v1549_v43 = vld [vmem:[#allocation8 + $0x1e8] sm:$0xff]  }
  0x61   :  { %v1550_v44 = vld [vmem:[#allocation8 + $0x128] sm:$0xff]  }
  0x62   :  { %1408 = vmatpush3.bf16.msra.mxu0 %v1518_v45  ;;  %v1551_v45 = vld [vmem:[#allocation8 + $0x1a8] sm:$0xff]  }
  0x63   :  { %1430 = vmatpush3.bf16.msra.mxu1 %v1519_v46  ;;  %1409 = vmatprep.subr.bf16.mxu0 %v1520_v47  ;;  %v1552_v46 = vld [vmem:[#allocation8 + $0x160] sm:$0xff]  }
  0x64   :  { %1431 = vmatprep.subr.bf16.mxu1 %v1521_v48  ;;  %v1553_v47 = vld [vmem:[#allocation8 + $0x1e0] sm:$0xff]  }
  0x65   :  { %v1554_v48 = vld [vmem:[#allocation8 + $0x120] sm:$0xff]  }
  0x66   :  { %1410 = vmatpush3.bf16.msra.mxu0 %v1522_v49  ;;  %v1555_v49 = vld [vmem:[#allocation8 + $0x1a0] sm:$0xff]  }
  0x67   :  { %1432 = vmatpush3.bf16.msra.mxu1 %v1523_v50  ;;  %1411 = vmatprep.subr.bf16.mxu0 %v1524_v51  ;;  %v135_v50 = vsub.s32 5, %v1738_v7  ;;  %v143_v51 = vsub.s32 7, %v1738_v7 }
  0x68   :  { %1433 = vmatprep.subr.bf16.mxu1 %v1525_v52  ;;  %v1556_v52 = vld [vmem:[#allocation8 + $0x158] sm:$0xff]  }
  0x6a   :  { %1412 = vmatpush3.bf16.msra.mxu0 %v1526_v53  ;;  %v1557_v53 = vld [vmem:[#allocation8 + $0x1d8] sm:$0xff]  }
  0x6b   :  { %1434 = vmatpush3.bf16.msra.mxu1 %v1527_v54  ;;  %1413 = vmatprep.subr.bf16.mxu0 %v1528_v55  ;;  %v139_v54 = vsub.s32 6, %v1738_v7  ;;  %v1558_v55 = vld [vmem:[#allocation8 + $0x118] sm:$0xff]  }
  0x6c   :  { %1435 = vmatprep.subr.bf16.mxu1 %v1529_v56  ;;  %v1559_v56 = vld [vmem:[#allocation8 + $0x198] sm:$0xff]  }
  0x6e   :  { %1414 = vmatpush3.bf16.msra.mxu0 %v1530_v57  ;;  %v136_v57 = vrot.slane %v1742_v10, %v135_v50 }
  0x6f   :  { %1436 = vmatpush3.bf16.msra.mxu1 %v1531_v58  ;;  %1415 = vmatprep.subr.bf16.mxu0 %v1532_v59  ;;  %v144_v58 = vrot.slane %v1742_v10, %v143_v51  ;;  %v131_v59 = vsub.s32 4, %v1738_v7 }
  0x70   :  { %1437 = vmatprep.subr.bf16.mxu1 %v1533_v60 }
  0x71   :  { %v132_v9 = vrot.slane %v1742_v10, %v131_v59 }
  0x72   :  { %1416 = vmatpush3.bf16.msra.mxu0 %v1534_v61 }
  0x73   :  { %1438 = vmatpush3.bf16.msra.mxu1 %v1535_v62  ;;  %1417 = vmatprep.subr.bf16.mxu0 %v1536_v63  ;;  %v1560_v62 = vld [vmem:[#allocation8 + $0x150] sm:$0xff]  }
  0x74   :  { %1439 = vmatprep.subr.bf16.mxu1 %v1537_v1  ;;  %v1561_v63 = vld [vmem:[#allocation8 + $0x1d0] sm:$0xff]  }
  0x76   :  { %1418 = vmatpush3.bf16.msra.mxu0 %v1538_v2  ;;  %v140_v2 = vrot.slane %v1742_v10, %v139_v54  ;;  %v1568_v10 = vld [vmem:[#allocation8 + $0x140] sm:$0xff]  }
  0x77   :  { %1440 = vmatpush3.bf16.msra.mxu1 %v1539_v3  ;;  %1447 = vmatprep.subr.bf16.mxu0 %v1540_v4 }
  0x78   :  { %1469 = vmatprep.subr.bf16.mxu1 %v1541_v5 }
 0x101   :  { %v436_v17 = vpop.f32.mrf.mxu0 }
 0x102   :  { %v477_v18 = vpop.f32.mrf.mxu1  ;;  %v437_v19 = vadd.f32 %v436_v17, %v116_v13  ;;  %v1565_v13 = vld [vmem:[#allocation8 + $0x1c8] sm:$0xff]  }
 0x103   :  { %v478_v20 = vadd.f32 %v477_v18, %v124_v14  ;;  %v438_v21 = vpop.f32.mrf.mxu0 }
 0x104   :  { %v479_v22 = vpop.f32.mrf.mxu1  ;;  %v439_v24 = vadd.f32 %v438_v21, %v120_v15  ;;  %v566_v0 = vmax.f32 %v437_v19, 0.0  ;;  %v1566_v21 = vld [vmem:[#allocation8 + $0x108] sm:$0xff]  }
 0x105   :  { %v568_v23 = vmax.f32 %v478_v20, 0.0  ;;  %v480_v25 = vadd.f32 %v479_v22, %v128_v16  ;;  %v440_v26 = vpop.f32.mrf.mxu0  ;;  %v1567_v22 = vld [vmem:[#allocation8 + $0x188] sm:$0xff]  }
 0x106   :  { %v481_v27 = vpop.f32.mrf.mxu1  ;;  %v567_v28 = vmax.f32 %v439_v24, 0.0  ;;  %v574_v37 = vpack.c.bf16 %v566_v0, %v566_v0  ;;  %v1569_v24 = vld [vmem:[#allocation8 + $0x1c0] sm:$0xff]  }
 0x107   :  { %v569_v29 = vmax.f32 %v480_v25, 0.0  ;;  %v576_v30 = vpack.c.bf16 %v568_v23, %v568_v23  ;;  %v441_v31 = vpop.f32.mrf.mxu0  ;;  %v1570_v0 = vld [vmem:[#allocation8 + $0x100] sm:$0xff]  }
 0x108   :  { %v482_v32 = vpop.f32.mrf.mxu1  ;;  %v575_v33 = vpack.c.bf16 %v567_v28, %v567_v28  ;;  %v1571_v26 = vld [vmem:[#allocation8 + $0x180] sm:$0xff]  }
 0x109   :  { %v577_v34 = vpack.c.bf16 %v569_v29, %v569_v29 }
 0x10a   :  { %1133 = vmatprep.mubr.bf16.mxu0 %v575_v33 }
 0x10b   :  { %1173 = vmatprep.mubr.bf16.mxu1 %v577_v34  ;;  %1134 = vmatmul.mubr.bf16.vlgmr.msra.gmra.mxu0 %v574_v37 }
 0x10c   :  { %1174 = vmatmul.mubr.bf16.vlgmr.msra.gmra.mxu1 %v576_v30  ;;  %1448 = vmatpush3.bf16.msra.mxu0 %v1542_v35 }
 0x10d   :  { %1470 = vmatpush3.bf16.msra.mxu1 %v1543_v36  ;;  %1449 = vmatprep.subr.bf16.mxu0 %v1544_v38 }
 0x10e   :  { %1471 = vmatprep.subr.bf16.mxu1 %v1545_v39  ;;  %v1338_v39 = vld [vmem:[%s1772_s5] ss:$0 sm:$0xff]  ;;  %s1668_s5 = smov [#allocation9]  }
 0x10f   :  { %s1272_s18 = sshll.u32 %s1668_s5, 4  ;;  %s1273_s18 = int_to_ptr.vmem [resolvable:$true] %s1272_s18 }
 0x110   :  { %1450 = vmatpush3.bf16.msra.mxu0 %v1546_v40  ;;  %s1634_s19 = scalar_lea.vmem %s1273_s18, 32  ;;  %p1639_p2 = scmp.lt.s32.totalorder %s1273_s18, %s1273_s18 }
 0x111   :  { %1472 = vmatpush3.bf16.msra.mxu1 %v1547_v41  ;;  %1451 = vmatprep.subr.bf16.mxu0 %v1548_v42  ;;  %p1635_p1 = scmp.ne.s32.totalorder %s1273_s18, %s1634_s19  ;;  %p1640_p3 = scmp.lt.s32.totalorder %s1634_s19, %s1634_s19 }
 0x112   :  { %1473 = vmatprep.subr.bf16.mxu1 %v1549_v43 }
 0x113   :  { %p1641_p4 = por %p1640_p3, %p1639_p2 }
 0x114   :  { %1452 = vmatpush3.bf16.msra.mxu0 %v1550_v44 }
 0x115   :  { %1474 = vmatpush3.bf16.msra.mxu1 %v1551_v45  ;;  %1453 = vmatprep.subr.bf16.mxu0 %v1552_v46  ;;  %p1642_p5 = pnand %p1641_p4, %p1635_p1 }
 0x116   :  { %1475 = vmatprep.subr.bf16.mxu1 %v1553_v47 }
 0x118   :  { %1454 = vmatpush3.bf16.msra.mxu0 %v1554_v48 }
 0x119   :  { %1476 = vmatpush3.bf16.msra.mxu1 %v1555_v49  ;;  %v518_v60 = vpop.f32.mrf.mxu0  ;;  %1455 = vmatprep.subr.bf16.mxu0 %v1556_v52 }
 0x11a   :  { %1477 = vmatprep.subr.bf16.mxu1 %v1557_v53  ;;  %v559_v61 = vpop.f32.mrf.mxu1  ;;  %v519_v23 = vadd.f32 %v518_v60, %v132_v9 }
 0x11b   :  { %v520_v1 = vpop.f32.mrf.mxu0  ;;  %v560_v16 = vadd.f32 %v559_v61, %v140_v2 }
 0x11c   :  { %v561_v3 = vpop.f32.mrf.mxu1  ;;  %1456 = vmatpush3.bf16.msra.mxu0 %v1558_v55  ;;  %v521_v4 = vadd.f32 %v520_v1, %v136_v57  ;;  %v570_v27 = vmax.f32 %v519_v23, 0.0  ;;  %v1263_v55 = vstv %s1767_s0 }
 0x11d   :  { %1478 = vmatpush3.bf16.msra.mxu1 %v1559_v56  ;;  %v562_v5 = vadd.f32 %v561_v3, %v144_v58  ;;  %v522_v11 = vpop.f32.mrf.mxu0  ;;  %1457 = vmatprep.subr.bf16.mxu0 %v1560_v62  ;;  %v572_v25 = vmax.f32 %v560_v16, 0.0 }
 0x11e   :  { %1479 = vmatprep.subr.bf16.mxu1 %v1561_v63  ;;  %v563_v7 = vpop.f32.mrf.mxu1  ;;  %v571_v14 = vmax.f32 %v521_v4, 0.0  ;;  %v578_v29 = vpack.c.bf16 %v570_v27, %v570_v27 }
 0x11f   :  { %v573_v15 = vmax.f32 %v562_v5, 0.0  ;;  %v523_v17 = vpop.f32.mrf.mxu0  ;;  %v580_v28 = vpack.c.bf16 %v572_v25, %v572_v25 }
 0x120   :  { %v564_v18 = vpop.f32.mrf.mxu1  ;;  %v579_v19 = vpack.c.bf16 %v571_v14, %v571_v14  ;;  %1458 = vmatpush3.bf16.msra.mxu0 %v1562_v6 }
 0x121   :  { %v581_v20 = vpack.c.bf16 %v573_v15, %v573_v15  ;;  %1480 = vmatpush3.bf16.msra.mxu1 %v1563_v8  ;;  %1459 = vmatprep.subr.bf16.mxu0 %v1564_v12 }
 0x122   :  { %1481 = vmatprep.subr.bf16.mxu1 %v1565_v13  ;;  %1213 = vmatprep.mubr.bf16.mxu0 %v579_v19 }
 0x123   :  { %1253 = vmatprep.mubr.bf16.mxu1 %v581_v20 }
 0x124   :  { %1460 = vmatpush3.bf16.msra.mxu0 %v1566_v21 }
 0x125   :  { %1482 = vmatpush3.bf16.msra.mxu1 %v1567_v22  ;;  %1461 = vmatprep.subr.bf16.mxu0 %v1568_v10 }
 0x126   :  { %1483 = vmatprep.subr.bf16.mxu1 %v1569_v24 }
 0x128   :  { %1462 = vmatpush3.bf16.msra.mxu0 %v1570_v0 }
 0x129   :  { %1484 = vmatpush3.bf16.msra.mxu1 %v1571_v26 }
 0x12b   :  { %1214 = vmatmul.mubr.bf16.vlgmr.msra.gmra.mxu0 %v578_v29 }
 0x12c   :  { %1254 = vmatmul.mubr.bf16.vlgmr.msra.gmra.mxu1 %v580_v28 }
 0x1cb   :  { %v1419_v30 = vpop.f32.mrf.mxu0 }
 0x1cc   :  { %v1441_v31 = vpop.f32.mrf.mxu1 }
 0x1cd   :  { %v1420_v32 = vpop.f32.mrf.mxu0 }
 0x1ce   :  { %v1442_v33 = vpop.f32.mrf.mxu1  ;;  %v1421_v38 = vadd.f32 %v1420_v32, %v1419_v30 }
 0x1cf   :  { %v1422_v34 = vpop.f32.mrf.mxu0  ;;  %v1443_v43 = vadd.f32 %v1442_v33, %v1441_v31 }
 0x1d0   :  { %v1444_v35 = vpop.f32.mrf.mxu1  ;;  %v1136_v40 = vadd.f32 %v1421_v38, %v1338_v39 }
 0x1d1   :  { %v1423_v36 = vpop.f32.mrf.mxu0 }
 0x1d2   :  { %v1445_v37 = vpop.f32.mrf.mxu1  ;;  %v1176_v46 = vadd.f32 %v1443_v43, %v1136_v40 }
 0x1eb   :  { %v1463_v41 = vpop.f32.mrf.mxu0 }
 0x1ec   :  { %v1485_v42 = vpop.f32.mrf.mxu1 }
 0x1ed   :  { %v1464_v44 = vpop.f32.mrf.mxu0 }
 0x1ee   :  { %v1486_v45 = vpop.f32.mrf.mxu1  ;;  %v1465_v47 = vadd.f32 %v1464_v44, %v1463_v41 }
 0x1ef   :  { %v1466_v48 = vpop.f32.mrf.mxu0  ;;  %v1487_v51 = vadd.f32 %v1486_v45, %v1485_v42 }
 0x1f0   :  { %v1488_v49 = vpop.f32.mrf.mxu1  ;;  %v1216_v50 = vadd.f32 %v1465_v47, %v1176_v46 }
 0x1f1   :  { %v1467_v52 = vpop.f32.mrf.mxu0 }
 0x1f2   :  { %v1489_v53 = vpop.f32.mrf.mxu1  ;;  %v1256_v54 = vadd.f32 %v1487_v51, %v1216_v50 }
 0x1f4   :  { %1572 = vtanh.f32 %v1256_v54 }
 0x201   :  { %v1573_v56 = vpop.eup %1572 }
 0x202   :  { %v1264_v57 = vmul.f32 %v1573_v56, %v1263_v55 }
 0x204   :  { %1265 = vst [vmem:[#allocation9] sm:$0x3] %v1264_v57 }
 0x205   :  { %1645 = shalt.err (!%p1642_p5)
}
 0x206   :  { %1275 = dma.vmem_to_hbm [thread:$0]  %s1273_s18, 32, %s1773_s6, [#allocation5]  }
 0x207   :  { %1658 = dma.done.wait [#allocation5], 32  }
 0x208   :  { %1659 = vsyncadd [#allocation5], 4294967264 }
 0x209   :  { %1279 = vsyncpa [#allocation4], 1 }
 0x20a   :  { %1280 = vsyncpa [#allocation7], 1 }
 0x20b   :  { %1281 = vsyncpa [#allocation5], 1 }

</bundles_post_ra>
